<compile_context>
chip_gen: v6e
topology: v6e:2x2x1
jax: 0.10.0
libtpu: 0.0.40
codegen_flags: <defaults>
</compile_context>

<pallas_src>
import functools

import jax
import jax.numpy as jnp
from jax.experimental import pallas as pl
from jax.experimental.pallas import tpu as pltpu

_LANE = 128
_SUBLANE = 8


def _round_up(n: int, m: int) -> int:
    return ((n + m - 1) // m) * m


def _mlp_fused_kernel(*refs, n_layers: int):
    """Fused MLP on one batch tile.

    refs = (x_ref, w0_ref, b0_ref, w1_ref, b1_ref, ..., o_ref).
    Hidden layers: h = tanh(h @ W + b); final layer: h = h @ W + b.
    Intermediates never leave VMEM/vregs; accumulation is always f32.
    """
    x_ref = refs[0]
    o_ref = refs[-1]
    h = x_ref[...]
    for i in range(n_layers):
        w_ref = refs[1 + 2 * i]
        b_ref = refs[2 + 2 * i]
        # If weights are bf16, feed the MXU bf16 operands (fast path) but keep
        # the accumulation in f32 via preferred_element_type.
        lhs = h if h.dtype == w_ref.dtype else h.astype(w_ref.dtype)
        h = jnp.dot(lhs, w_ref[...], preferred_element_type=jnp.float32)
        h = h + b_ref[...].astype(jnp.float32)  # (1, dout) broadcasts over rows
        if i < n_layers - 1:
            h = jnp.tanh(h)  # EUP, f32 (v5e has no bf16 EUP path)
    o_ref[...] = h.astype(o_ref.dtype)


@functools.partial(jax.jit, static_argnames=("batch_tile",))
def value_network_forward(params, x, batch_tile: int = 512):
    """Forward pass of the full MLP as ONE fused Pallas kernel.

    params: list of (W, b) with W of shape (in, out) (transposed vs PyTorch),
            b of shape (out,).
    x: (B, num_inputs) -> returns (B, num_outputs).
    """
    n_layers = len(params)
    B, Din = x.shape
    Dout = params[-1][0].shape[1]

    # ---- lane-dense feature padding (exact; see header comment) -------------
    dims = [Din] + [w.shape[1] for (w, _) in params]
    dims_p = [_round_up(d, _LANE) for d in dims]

    padded = []
    for i, (w, b) in enumerate(params):
        din, dout = w.shape
        din_p, dout_p = dims_p[i], dims_p[i + 1]
        w_p = jnp.pad(w, ((0, din_p - din), (0, dout_p - dout)))
        b_p = jnp.pad(b, (0, dout_p - dout)).reshape(1, dout_p)
        padded.append((w_p, b_p))
    Din_p, Dout_p = dims_p[0], dims_p[-1]

    # ---- batch tiling --------------------------------------------------------
    # Large B: 512-row tiles (amortizes the ~0.35 us/grid-step overhead).
    # Mid-size B: split into >= 2 tiles so v7x's 2 TensorCores both get work.
    # Tiny B (demo): a single whole-batch tile.
    if B > batch_tile:
        tb = batch_tile
    elif B >= 2 * _LANE:
        tb = _round_up(pl.cdiv(B, 2), _SUBLANE)
    else:
        tb = _round_up(B, _SUBLANE)
    pad_b = (-B) % tb
    x_p = jnp.pad(x, ((0, pad_b), (0, Din_p - Din)))
    Bp = x_p.shape[0]
    grid = (Bp // tb,)

    # ---- specs ---------------------------------------------------------------
    flat_inputs = [x_p]
    # Streaming input: default double-buffering. (If DMA is still exposed at
    # large B, sweep pipeline_mode=pl.Buffered(3) here.)
    in_specs = [pl.BlockSpec((tb, Din_p), lambda i: (i, 0))]
    for (w_p, b_p) in padded:
        din_p, dout_p = w_p.shape
        flat_inputs.append(w_p)
        flat_inputs.append(b_p)
        # Constant index_map -> fetched once, VMEM-resident across grid steps;
        # Buffered(1) -> single copy (no pointless double-buffer of weights).
        in_specs.append(
            pl.BlockSpec((din_p, dout_p), lambda i: (0, 0),
                         pipeline_mode=pl.Buffered(1)))
        in_specs.append(
            pl.BlockSpec((1, dout_p), lambda i: (0, 0),
                         pipeline_mode=pl.Buffered(1)))

    # ---- explicit VMEM budget (v5e default scoped limit is only 16 MiB) -----
    bytes_x = 2 * tb * Din_p * x_p.dtype.itemsize           # double-buffered
    bytes_o = 2 * tb * Dout_p * x.dtype.itemsize             # double-buffered
    bytes_w = sum(w.size * w.dtype.itemsize + b.size * b.dtype.itemsize
                  for (w, b) in padded)                       # single-buffered
    bytes_act = 2 * tb * max(dims_p) * 4                      # live f32 acts
    est = bytes_x + bytes_o + bytes_w + bytes_act
    vmem_limit = int(min(max(2 * est, 32 * 1024 * 1024), 64 * 1024 * 1024))

    kernel = functools.partial(_mlp_fused_kernel, n_layers=n_layers)
    out = pl.pallas_call(
        kernel,
        out_shape=jax.ShapeDtypeStruct((Bp, Dout_p), x.dtype),
        grid=grid,
        in_specs=in_specs,
        out_specs=pl.BlockSpec((tb, Dout_p), lambda i: (i, 0)),
        compiler_params=pltpu.CompilerParams(
            # Batch axis is embarrassingly parallel -> v7x splits it across its
            # 2 TensorCores; harmless on v5e/v6e.
            dimension_semantics=("parallel",),
            vmem_limit_bytes=vmem_limit,
        ),
    )(*flat_inputs)
    return out[:B, :Dout]


def init_value_network_params(key, num_inputs, num_hiddens, num_outputs,
                              dtype=jnp.float32):
    """Deterministic params mimicking torch.nn.Linear default init.

    Returns list of (W, b) with W of shape (in, out) -- transposed vs PyTorch.
    Final layer: weight *= 0.1, bias *= 0.0 (as in the module's __init__).
    """
    params = []
    dims = [num_inputs] + list(num_hiddens) + [num_outputs]
    keys = jax.random.split(key, len(dims) - 1)
    for i, (din, dout) in enumerate(zip(dims[:-1], dims[1:])):
        kw, kb = jax.random.split(keys[i])
        bound = 1.0 / jnp.sqrt(jnp.float32(din))
        w = jax.random.uniform(kw, (din, dout), jnp.float32, -bound, bound)
        b = jax.random.uniform(kb, (dout,), jnp.float32, -bound, bound)
        if i == len(dims) - 2:  # action layer
            w = w * 0.1
            b = b * 0.0
        params.append((w.astype(dtype), b.astype(dtype)))
    return params


if __name__ == "__main__":
    key = jax.random.PRNGKey(0)
    k_param, k_x = jax.random.split(key)

    batch = 8
    num_inputs = 16
    num_hiddens = [32, 32]
    num_outputs = 4

    params = init_value_network_params(k_param, num_inputs, num_hiddens,
                                       num_outputs, dtype=jnp.float32)
    x = jax.random.normal(k_x, (batch, num_inputs), jnp.float32)

    out = value_network_forward(params, x)
    out = jax.block_until_ready(out)

    # Pure-JAX reference check
    ref = x
    for i, (w, b) in enumerate(params):
        ref = ref @ w + b
        if i < len(params) - 1:
            ref = jnp.tanh(ref)
    assert out.shape == (batch, num_outputs)
    assert jnp.allclose(out, ref, atol=1e-5, rtol=1e-5)

    print("KERNEL_OK")
</pallas_src>

<mosaic_0001>
module attributes {stable_mosaic.version = 11 : i64} {
  func.func @_mlp_fused_kernel(%arg0: i32, %arg1: memref<8x128xf32, #tpu.memory_space<vmem>>, %arg2: memref<128x128xf32, #tpu.memory_space<vmem>>, %arg3: memref<1x128xf32, #tpu.memory_space<vmem>>, %arg4: memref<128x128xf32, #tpu.memory_space<vmem>>, %arg5: memref<1x128xf32, #tpu.memory_space<vmem>>, %arg6: memref<128x128xf32, #tpu.memory_space<vmem>>, %arg7: memref<1x128xf32, #tpu.memory_space<vmem>>, %arg8: memref<8x128xf32, #tpu.memory_space<vmem>>) attributes {dimension_semantics = [#tpu.dimension_semantics<parallel>], iteration_bounds = array<i64: 1>, scalar_prefetch = 0 : i64, scratch_operands = 0 : i64, tpu.core_type = #tpu.core_type<tc>, window_params = [{transform_indices = @transform_0, window_bounds = array<i64: 8, 128>}, {pipeline_mode = #tpu.pipeline_mode<synchronous>, transform_indices = @transform_1, window_bounds = array<i64: 128, 128>}, {pipeline_mode = #tpu.pipeline_mode<synchronous>, transform_indices = @transform_2, window_bounds = array<i64: 1, 128>}, {pipeline_mode = #tpu.pipeline_mode<synchronous>, transform_indices = @transform_3, window_bounds = array<i64: 128, 128>}, {pipeline_mode = #tpu.pipeline_mode<synchronous>, transform_indices = @transform_4, window_bounds = array<i64: 1, 128>}, {pipeline_mode = #tpu.pipeline_mode<synchronous>, transform_indices = @transform_5, window_bounds = array<i64: 128, 128>}, {pipeline_mode = #tpu.pipeline_mode<synchronous>, transform_indices = @transform_6, window_bounds = array<i64: 1, 128>}, {transform_indices = @transform_7, window_bounds = array<i64: 8, 128>}]} {
    %c0 = arith.constant 0 : index
    %c0_0 = arith.constant 0 : index
    %0 = vector.load %arg1[%c0, %c0_0] : memref<8x128xf32, #tpu.memory_space<vmem>>, vector<8x128xf32>
    %c0_1 = arith.constant 0 : index
    %c0_2 = arith.constant 0 : index
    %1 = vector.load %arg2[%c0_1, %c0_2] : memref<128x128xf32, #tpu.memory_space<vmem>>, vector<128x128xf32>
    %cst = arith.constant dense<0.000000e+00> : vector<8x128xf32>
    %2 = tpu.matmul %0, %1, %cst {dimension_numbers = #tpu.dot_dimension_numbers<[1], [0], [0], [1], [0, 0, 1, 1], [], []>} : vector<8x128xf32>, vector<128x128xf32>, vector<8x128xf32> -> vector<8x128xf32>
    %c0_3 = arith.constant 0 : index
    %c0_4 = arith.constant 0 : index
    %3 = vector.load %arg3[%c0_3, %c0_4] : memref<1x128xf32, #tpu.memory_space<vmem>>, vector<1x128xf32>
    %4 = vector.broadcast %3 : vector<1x128xf32> to vector<8x128xf32>
    %5 = arith.addf %2, %4 : vector<8x128xf32>
    %6 = math.tanh %5 : vector<8x128xf32>
    %c0_5 = arith.constant 0 : index
    %c0_6 = arith.constant 0 : index
    %7 = vector.load %arg4[%c0_5, %c0_6] : memref<128x128xf32, #tpu.memory_space<vmem>>, vector<128x128xf32>
    %cst_7 = arith.constant dense<0.000000e+00> : vector<8x128xf32>
    %8 = tpu.matmul %6, %7, %cst_7 {dimension_numbers = #tpu.dot_dimension_numbers<[1], [0], [0], [1], [0, 0, 1, 1], [], []>} : vector<8x128xf32>, vector<128x128xf32>, vector<8x128xf32> -> vector<8x128xf32>
    %c0_8 = arith.constant 0 : index
    %c0_9 = arith.constant 0 : index
    %9 = vector.load %arg5[%c0_8, %c0_9] : memref<1x128xf32, #tpu.memory_space<vmem>>, vector<1x128xf32>
    %10 = vector.broadcast %9 : vector<1x128xf32> to vector<8x128xf32>
    %11 = arith.addf %8, %10 : vector<8x128xf32>
    %12 = math.tanh %11 : vector<8x128xf32>
    %c0_10 = arith.constant 0 : index
    %c0_11 = arith.constant 0 : index
    %13 = vector.load %arg6[%c0_10, %c0_11] : memref<128x128xf32, #tpu.memory_space<vmem>>, vector<128x128xf32>
    %cst_12 = arith.constant dense<0.000000e+00> : vector<8x128xf32>
    %14 = tpu.matmul %12, %13, %cst_12 {dimension_numbers = #tpu.dot_dimension_numbers<[1], [0], [0], [1], [0, 0, 1, 1], [], []>} : vector<8x128xf32>, vector<128x128xf32>, vector<8x128xf32> -> vector<8x128xf32>
    %c0_13 = arith.constant 0 : index
    %c0_14 = arith.constant 0 : index
    %15 = vector.load %arg7[%c0_13, %c0_14] : memref<1x128xf32, #tpu.memory_space<vmem>>, vector<1x128xf32>
    %16 = vector.broadcast %15 : vector<1x128xf32> to vector<8x128xf32>
    %17 = arith.addf %14, %16 : vector<8x128xf32>
    %c0_15 = arith.constant 0 : index
    %c0_16 = arith.constant 0 : index
    %18 = vector.load %arg8[%c0_15, %c0_16] : memref<8x128xf32, #tpu.memory_space<vmem>>, vector<8x128xf32>
    tpu.vector_store %arg8[%c0_15, %c0_16], %17 {strides = array<i32>} : memref<8x128xf32, #tpu.memory_space<vmem>>, vector<8x128xf32>,
    return
  }
  func.func @transform_0(%arg0: i32) -> (i32, i32) {
    %c0_i32 = arith.constant 0 : i32
    %c0_i32_0 = arith.constant 0 : i32
    return %arg0, %c0_i32 : i32, i32
  }
  func.func @transform_1(%arg0: i32) -> (i32, i32) {
    %c0_i32 = arith.constant 0 : i32
    %c0_i32_0 = arith.constant 0 : i32
    %c0_i32_1 = arith.constant 0 : i32
    return %c0_i32, %c0_i32_0 : i32, i32
  }
  func.func @transform_2(%arg0: i32) -> (i32, i32) {
    %c0_i32 = arith.constant 0 : i32
    %c0_i32_0 = arith.constant 0 : i32
    %c0_i32_1 = arith.constant 0 : i32
    return %c0_i32, %c0_i32_0 : i32, i32
  }
  func.func @transform_3(%arg0: i32) -> (i32, i32) {
    %c0_i32 = arith.constant 0 : i32
    %c0_i32_0 = arith.constant 0 : i32
    %c0_i32_1 = arith.constant 0 : i32
    return %c0_i32, %c0_i32_0 : i32, i32
  }
  func.func @transform_4(%arg0: i32) -> (i32, i32) {
    %c0_i32 = arith.constant 0 : i32
    %c0_i32_0 = arith.constant 0 : i32
    %c0_i32_1 = arith.constant 0 : i32
    return %c0_i32, %c0_i32_0 : i32, i32
  }
  func.func @transform_5(%arg0: i32) -> (i32, i32) {
    %c0_i32 = arith.constant 0 : i32
    %c0_i32_0 = arith.constant 0 : i32
    %c0_i32_1 = arith.constant 0 : i32
    return %c0_i32, %c0_i32_0 : i32, i32
  }
  func.func @transform_6(%arg0: i32) -> (i32, i32) {
    %c0_i32 = arith.constant 0 : i32
    %c0_i32_0 = arith.constant 0 : i32
    %c0_i32_1 = arith.constant 0 : i32
    return %c0_i32, %c0_i32_0 : i32, i32
  }
  func.func @transform_7(%arg0: i32) -> (i32, i32) {
    %c0_i32 = arith.constant 0 : i32
    %c0_i32_0 = arith.constant 0 : i32
    return %arg0, %c0_i32 : i32, i32
  }
}

</mosaic_0001>

<bundles_post_ra>
// kernel: value_network_forward.1
= control target key start
LH: loop header
LB: loop body
LE: loop exit
PB: predicated region body
PF: predicated region fallthrough
CT: control target
= control target key end

     0   :  { %v478_v0 = vmov 0.0   ;;  %vm479_vm0 = vmmov 0   ;;  %s733_s1 = inlined_call_operand.vmem [shape: f32[128,128], index: 1, kind: input, shape index: {}]   ;;  %s734_s3 = inlined_call_operand.vmem [shape: f32[128,128], index: 3, kind: input, shape index: {}]   ;;  %s735_s0 = inlined_call_operand.vmem [shape: f32[8,128], index: 0, kind: input, shape index: {}]   ;;  %s736_s5 = inlined_call_operand.vmem [shape: f32[128,128], index: 5, kind: input, shape index: {}]   ;;  %s737_s2 = inlined_call_operand.vmem [shape: f32[1,128], index: 2, kind: input, shape index: {}]   ;;  %s738_s4 = inlined_call_operand.vmem [shape: f32[1,128], index: 4, kind: input, shape index: {}]   ;;  %s739_s6 = inlined_call_operand.vmem [shape: f32[1,128], index: 6, kind: input, shape index: {}]   ;;  %s740_s7 = inlined_call_operand.vmem [shape: f32[8,128], index: 7, kind: output, shape index: {}]  }
   0x1   :  { %367 = vmatprep.subr.mxu0 %v478_v0  ;;  %v42_v1 = vld [vmem:[%s733_s1 + $0x78] sm:$0xff]  ;;  %v41_v2 = vld [vmem:[%s733_s1 + $0x70] sm:$0xff]  ;;  %399 = vmatprep.mubr.msk.f32.mxu0 %vm479_vm0, %v478_v0  ;;  %v40_v3 = vld [vmem:[%s733_s1 + $0x68] sm:$0xff] }
   0x2   :  { %368 = vmatpush3.msra.mxu0 %v42_v1  ;;  %402 = vmatprep.subr.mxu1 %v478_v0  ;;  %v39_v4 = vld [vmem:[%s733_s1 + $0x60] sm:$0xff]  ;;  %v136_v5 = vld [vmem:[%s734_s3 + $0x78] sm:$0xff]  ;;  %v135_v7 = vld [vmem:[%s734_s3 + $0x70] sm:$0xff] }
   0x3   :  { %369 = vmatprep.subr.mxu0 %v478_v0  ;;  %434 = vmatprep.mubr.msk.f32.mxu1 %vm479_vm0, %v478_v0  ;;  %v38_v6 = vld [vmem:[%s733_s1 + $0x58] sm:$0xff]  ;;  %v134_v8 = vld [vmem:[%s734_s3 + $0x68] sm:$0xff]  ;;  %v37_v9 = vld [vmem:[%s733_s1 + $0x50] sm:$0xff] }
   0x4   :  { %370 = vmatpush3.msra.mxu0 %v41_v2  ;;  %403 = vmatpush3.msra.mxu1 %v136_v5  ;;  %v133_v10 = vld [vmem:[%s734_s3 + $0x60] sm:$0xff]  ;;  %v36_v11 = vld [vmem:[%s733_s1 + $0x48] sm:$0xff]  ;;  %v132_v12 = vld [vmem:[%s734_s3 + $0x58] sm:$0xff] }
   0x5   :  { %371 = vmatprep.subr.mxu0 %v478_v0  ;;  %404 = vmatprep.subr.mxu1 %v478_v0  ;;  %v35_v13 = vld [vmem:[%s733_s1 + $0x40] sm:$0xff]  ;;  %v131_v14 = vld [vmem:[%s734_s3 + $0x50] sm:$0xff]  ;;  %v34_v15 = vld [vmem:[%s733_s1 + $0x38] sm:$0xff] }
   0x6   :  { %372 = vmatpush3.msra.mxu0 %v40_v3  ;;  %405 = vmatpush3.msra.mxu1 %v135_v7  ;;  %v130_v16 = vld [vmem:[%s734_s3 + $0x48] sm:$0xff]  ;;  %v33_v17 = vld [vmem:[%s733_s1 + $0x30] sm:$0xff]  ;;  %v31_v19 = vld [vmem:[%s733_s1 + $0x20] sm:$0xff] }
   0x7   :  { %373 = vmatprep.subr.mxu0 %v478_v0  ;;  %406 = vmatprep.subr.mxu1 %v478_v0  ;;  %v32_v18 = vld [vmem:[%s733_s1 + $0x28] sm:$0xff]  ;;  %v30_v20 = vld [vmem:[%s733_s1 + $0x18] sm:$0xff]  ;;  %v29_v21 = vld [vmem:[%s733_s1 + $0x10] sm:$0xff] }
   0x8   :  { %374 = vmatpush3.msra.mxu0 %v39_v4  ;;  %407 = vmatpush3.msra.mxu1 %v134_v8  ;;  %v28_v22 = vld [vmem:[%s733_s1 + $0x8] sm:$0xff]  ;;  %v27_v23 = vld [vmem:[%s733_s1] sm:$0xff]  ;;  %v128_v26 = vld [vmem:[%s734_s3 + $0x38] sm:$0xff] }
   0x9   :  { %375 = vmatprep.subr.mxu0 %v478_v0  ;;  %408 = vmatprep.subr.mxu1 %v478_v0  ;;  %v26_v24 = vld [vmem:[%s735_s0] sm:$0xff]  ;;  %v127_v27 = vld [vmem:[%s734_s3 + $0x30] sm:$0xff]  ;;  %v126_v28 = vld [vmem:[%s734_s3 + $0x28] sm:$0xff] }
   0xa   :  { %376 = vmatpush3.msra.mxu0 %v38_v6  ;;  %409 = vmatpush3.msra.mxu1 %v133_v10  ;;  %v129_v25 = vld [vmem:[%s734_s3 + $0x40] sm:$0xff]  ;;  %v124_v30 = vld [vmem:[%s734_s3 + $0x18] sm:$0xff]  ;;  %v123_v31 = vld [vmem:[%s734_s3 + $0x10] sm:$0xff] }
   0xb   :  { %377 = vmatprep.subr.mxu0 %v478_v0  ;;  %410 = vmatprep.subr.mxu1 %v478_v0  ;;  %v125_v29 = vld [vmem:[%s734_s3 + $0x20] sm:$0xff]  ;;  %v122_v32 = vld [vmem:[%s734_s3 + $0x8] sm:$0xff]  ;;  %v230_v34 = vld [vmem:[%s736_s5 + $0x78] sm:$0xff] }
   0xc   :  { %378 = vmatpush3.msra.mxu0 %v37_v9  ;;  %411 = vmatpush3.msra.mxu1 %v132_v12  ;;  %v121_v33 = vld [vmem:[%s734_s3] sm:$0xff]  ;;  %v229_v35 = vld [vmem:[%s736_s5 + $0x70] sm:$0xff]  ;;  %v228_v36 = vld [vmem:[%s736_s5 + $0x68] sm:$0xff] }
   0xd   :  { %379 = vmatprep.subr.mxu0 %v478_v0  ;;  %412 = vmatprep.subr.mxu1 %v478_v0  ;;  %v227_v37 = vld [vmem:[%s736_s5 + $0x60] sm:$0xff]  ;;  %v226_v38 = vld [vmem:[%s736_s5 + $0x58] sm:$0xff]  ;;  %v225_v39 = vld [vmem:[%s736_s5 + $0x50] sm:$0xff] }
   0xe   :  { %380 = vmatpush3.msra.mxu0 %v36_v11  ;;  %413 = vmatpush3.msra.mxu1 %v131_v14  ;;  %v224_v40 = vld [vmem:[%s736_s5 + $0x48] sm:$0xff]  ;;  %v313_v41 = vld [vmem:[%s737_s2] ss:$0 sm:$0xff]  ;;  %v222_v47 = vld [vmem:[%s736_s5 + $0x38] sm:$0xff] }
   0xf   :  { %381 = vmatprep.subr.mxu0 %v478_v0  ;;  %414 = vmatprep.subr.mxu1 %v478_v0  ;;  %v223_v46 = vld [vmem:[%s736_s5 + $0x40] sm:$0xff]  ;;  %v221_v48 = vld [vmem:[%s736_s5 + $0x30] sm:$0xff]  ;;  %v220_v49 = vld [vmem:[%s736_s5 + $0x28] sm:$0xff] }
  0x10   :  { %382 = vmatpush3.msra.mxu0 %v35_v13  ;;  %415 = vmatpush3.msra.mxu1 %v130_v16  ;;  %v219_v50 = vld [vmem:[%s736_s5 + $0x20] sm:$0xff]  ;;  %v218_v51 = vld [vmem:[%s736_s5 + $0x18] sm:$0xff]  ;;  %v217_v52 = vld [vmem:[%s736_s5 + $0x10] sm:$0xff] }
  0x11   :  { %383 = vmatprep.subr.mxu0 %v478_v0  ;;  %416 = vmatprep.subr.mxu1 %v478_v0  ;;  %v216_v53 = vld [vmem:[%s736_s5 + $0x8] sm:$0xff]  ;;  %v215_v54 = vld [vmem:[%s736_s5] sm:$0xff] }
  0x12   :  { %384 = vmatpush3.msra.mxu0 %v34_v15  ;;  %417 = vmatpush3.msra.mxu1 %v129_v25  ;;  %v314_v55 = vld [vmem:[%s738_s4] ss:$0 sm:$0xff] }
  0x13   :  { %385 = vmatprep.subr.mxu0 %v478_v0  ;;  %418 = vmatprep.subr.mxu1 %v478_v0  ;;  %v315_v60 = vld [vmem:[%s739_s6] ss:$0 sm:$0xff] }
  0x14   :  { %386 = vmatpush3.msra.mxu0 %v33_v17  ;;  %419 = vmatpush3.msra.mxu1 %v128_v26 }
  0x15   :  { %387 = vmatprep.subr.mxu0 %v478_v0  ;;  %420 = vmatprep.subr.mxu1 %v478_v0 }
  0x16   :  { %388 = vmatpush3.msra.mxu0 %v32_v18  ;;  %421 = vmatpush3.msra.mxu1 %v127_v27 }
  0x17   :  { %389 = vmatprep.subr.mxu0 %v478_v0  ;;  %422 = vmatprep.subr.mxu1 %v478_v0 }
  0x18   :  { %390 = vmatpush3.msra.mxu0 %v31_v19  ;;  %423 = vmatpush3.msra.mxu1 %v126_v28 }
  0x19   :  { %391 = vmatprep.subr.mxu0 %v478_v0  ;;  %424 = vmatprep.subr.mxu1 %v478_v0 }
  0x1a   :  { %392 = vmatpush3.msra.mxu0 %v30_v20  ;;  %425 = vmatpush3.msra.mxu1 %v125_v29 }
  0x1b   :  { %393 = vmatprep.subr.mxu0 %v478_v0  ;;  %426 = vmatprep.subr.mxu1 %v478_v0 }
  0x1c   :  { %394 = vmatpush3.msra.mxu0 %v29_v21  ;;  %427 = vmatpush3.msra.mxu1 %v124_v30 }
  0x1d   :  { %395 = vmatprep.subr.mxu0 %v478_v0  ;;  %428 = vmatprep.subr.mxu1 %v478_v0 }
  0x1e   :  { %396 = vmatpush3.msra.mxu0 %v28_v22  ;;  %429 = vmatpush3.msra.mxu1 %v123_v31 }
  0x1f   :  { %397 = vmatprep.subr.mxu0 %v478_v0  ;;  %430 = vmatprep.subr.mxu1 %v478_v0 }
  0x20   :  { %398 = vmatpush3.msra.mxu0 %v27_v23  ;;  %431 = vmatpush3.msra.mxu1 %v122_v32 }
  0x21   :  { %400 = vmatmul.mubr.f32.vlgmr.msra.gmra.mxu0 %v26_v24  ;;  %437 = vmatprep.subr.mxu0 %v478_v0 }
  0x22   :  { %469 = vmatprep.mubr.msk.f32.mxu0 %vm479_vm0, %v478_v0  ;;  %432 = vmatprep.subr.mxu1 %v478_v0 }
  0x23   :  { %433 = vmatpush3.msra.mxu1 %v121_v33  ;;  %438 = vmatpush3.msra.mxu0 %v230_v34 }
  0x24   :  { %439 = vmatprep.subr.mxu0 %v478_v0 }
  0x25   :  { %440 = vmatpush3.msra.mxu0 %v229_v35 }
  0x26   :  { %441 = vmatprep.subr.mxu0 %v478_v0 }
  0x27   :  { %442 = vmatpush3.msra.mxu0 %v228_v36 }
  0x28   :  { %443 = vmatprep.subr.mxu0 %v478_v0 }
  0x29   :  { %444 = vmatpush3.msra.mxu0 %v227_v37 }
  0x2a   :  { %445 = vmatprep.subr.mxu0 %v478_v0 }
  0x2b   :  { %446 = vmatpush3.msra.mxu0 %v226_v38 }
  0x2c   :  { %447 = vmatprep.subr.mxu0 %v478_v0 }
  0x2d   :  { %448 = vmatpush3.msra.mxu0 %v225_v39 }
  0x2e   :  { %449 = vmatprep.subr.mxu0 %v478_v0 }
  0x2f   :  { %450 = vmatpush3.msra.mxu0 %v224_v40 }
  0x30   :  { %451 = vmatprep.subr.mxu0 %v478_v0 }
  0x31   :  { %452 = vmatpush3.msra.mxu0 %v223_v46 }
  0x32   :  { %453 = vmatprep.subr.mxu0 %v478_v0 }
  0x33   :  { %454 = vmatpush3.msra.mxu0 %v222_v47 }
  0x34   :  { %455 = vmatprep.subr.mxu0 %v478_v0 }
  0x35   :  { %456 = vmatpush3.msra.mxu0 %v221_v48 }
  0x36   :  { %457 = vmatprep.subr.mxu0 %v478_v0 }
  0x37   :  { %458 = vmatpush3.msra.mxu0 %v220_v49 }
  0x38   :  { %459 = vmatprep.subr.mxu0 %v478_v0 }
  0x39   :  { %460 = vmatpush3.msra.mxu0 %v219_v50 }
  0x3a   :  { %461 = vmatprep.subr.mxu0 %v478_v0 }
  0x3b   :  { %462 = vmatpush3.msra.mxu0 %v218_v51 }
  0x3c   :  { %463 = vmatprep.subr.mxu0 %v478_v0 }
  0x3d   :  { %464 = vmatpush3.msra.mxu0 %v217_v52 }
  0x3e   :  { %465 = vmatprep.subr.mxu0 %v478_v0 }
  0x3f   :  { %466 = vmatpush3.msra.mxu0 %v216_v53 }
  0x40   :  { %467 = vmatprep.subr.mxu0 %v478_v0 }
  0x41   :  { %468 = vmatpush3.msra.mxu0 %v215_v54 }
  0xe1   :  { %v116_v42 = vpop.f32.mrf.mxu0 }
  0xe2   :  { %v117_v43 = vadd.f32 %v313_v41, %v116_v42 }
  0xe3   :  { %v401_v44 = vpop.f32.mrf.mxu0 }
  0xe4   :  { %474 = vtanh.f32 %v117_v43 }
  0xf1   :  { %v475_v45 = vpop.eup %474 }
  0xf2   :  { %435 = vmatmul.mubr.f32.vlgmr.msra.gmra.mxu1 %v475_v45 }
 0x1b2   :  { %v210_v56 = vpop.f32.mrf.mxu1 }
 0x1b3   :  { %v211_v57 = vadd.f32 %v314_v55, %v210_v56 }
 0x1b4   :  { %v436_v58 = vpop.f32.mrf.mxu1 }
 0x1b5   :  { %476 = vtanh.f32 %v211_v57 }
 0x1c2   :  { %v477_v59 = vpop.eup %476 }
 0x1c3   :  { %470 = vmatmul.mubr.f32.vlgmr.msra.gmra.mxu0 %v477_v59 }
 0x283   :  { %v304_v61 = vpop.f32.mrf.mxu0 }
 0x284   :  { %v305_v62 = vadd.f32 %v315_v60, %v304_v61 }
 0x285   :  { %v471_v63 = vpop.f32.mrf.mxu0 }
 0x286   :  { %308 = vst [vmem:[%s740_s7] sm:$0xff] %v305_v62 }

</bundles_post_ra>
